<compile_context>
chip_gen: v7x
topology: tpu7x:2x2x1
jax: 0.10.0
libtpu: 0.0.40
codegen_flags: <defaults>
</compile_context>

<pallas_src>
import jax
import jax.numpy as jnp
from jax.experimental import pallas as pl
from jax.experimental.pallas import tpu as pltpu


def _vae_head_kernel(p_ref, w_ref, b_ref, mu_ref, sd_ref):
    # p_ref: (K, Mtot)   w_ref: (2*n_out, K)   b_ref: (2*n_out, 1)
    # mu_ref/sd_ref: (n_out, Mtot)
    acc = jax.lax.dot(
        w_ref[...], p_ref[...],
        precision=jax.lax.Precision.HIGHEST,
        preferred_element_type=jnp.float32,
    ) + b_ref[...]                                   # (2*n_out, Mtot)

    c = mu_ref.shape[0]                              # n_out (vreg-tile aligned split)
    mu_ref[...] = acc[:c]
    sg = acc[c:]
    # Numerically stable softplus (PyTorch default beta=1): log(1 + exp(x)).
    sd_ref[...] = jnp.maximum(sg, 0.0) + jnp.log1p(jnp.exp(-jnp.abs(sg)))


def _im2col_lane_folded(x, kh, kw, stride, padding):
    """im2col with batch folded into the lane axis.

    Returns patches of shape (C*KH*KW, N*M_pad) where M_pad = OH*OW rounded up
    to a 128 multiple per batch. K index = c*(KH*KW) + i*KW + j, matching
    PyTorch weight.view(n_out, -1) flattening.
    """
    n, c, h, w = x.shape
    xp = jnp.pad(x, ((0, 0), (0, 0), (padding, padding), (padding, padding)))
    oh = (h + 2 * padding - kh) // stride + 1
    ow = (w + 2 * padding - kw) // stride + 1
    cols = []
    for i in range(kh):
        for j in range(kw):
            cols.append(xp[:, :, i:i + (oh - 1) * stride + 1:stride,
                              j:j + (ow - 1) * stride + 1:stride])
    # (N, C, KH*KW, OH, OW) -> (N, K, M)
    patches = jnp.stack(cols, axis=2).reshape(n, c * kh * kw, oh * ow)
    m_b = oh * ow
    m_pad = ((m_b + 127) // 128) * 128
    if m_pad != m_b:
        patches = jnp.pad(patches, ((0, 0), (0, 0), (0, m_pad - m_b)))
    # Fold batch into lanes: (K, N*M_pad).
    patches = jnp.transpose(patches, (1, 0, 2)).reshape(c * kh * kw, n * m_pad)
    return patches, oh, ow, m_pad


def gaussian_vae2d_forward(x, w_mu, b_mu, w_sigma, b_sigma, *, stride=1, padding=0):
    n, c_in, h, w = x.shape
    n_out, _, kh, kw = w_mu.shape
    k = c_in * kh * kw

    patches, oh, ow, m_pad = _im2col_lane_folded(
        x.astype(jnp.float32), kh, kw, stride, padding)
    m_b = oh * ow
    m_total = n * m_pad                               # lane-dense total width

    # Fuse the two heads: single weight (2*n_out, K) and bias (2*n_out, 1).
    wcat = jnp.concatenate(
        [w_mu.reshape(n_out, k), w_sigma.reshape(n_out, k)], axis=0
    ).astype(jnp.float32)
    bcat = jnp.concatenate([b_mu, b_sigma]).reshape(2 * n_out, 1).astype(jnp.float32)

    cost = pl.CostEstimate(
        flops=2 * (2 * n_out) * k * m_total,
        transcendentals=2 * n_out * m_total,          # exp + log1p per sigma elem
        bytes_accessed=4 * (k * m_total + 2 * n_out * k + 2 * n_out
                            + 2 * n_out * m_total),
    )

    mu2, sd2 = pl.pallas_call(
        _vae_head_kernel,
        out_shape=(jax.ShapeDtypeStruct((n_out, m_total), jnp.float32),
                   jax.ShapeDtypeStruct((n_out, m_total), jnp.float32)),
        grid_spec=pltpu.PrefetchScalarGridSpec(
            num_scalar_prefetch=0,
            grid=(1,),                                # single step: whole problem
            in_specs=[
                pl.BlockSpec((k, m_total), lambda i: (0, 0)),       # patches
                pl.BlockSpec((2 * n_out, k), lambda i: (0, 0)),     # fused weights
                pl.BlockSpec((2 * n_out, 1), lambda i: (0, 0)),     # fused bias
            ],
            out_specs=[
                pl.BlockSpec((n_out, m_total), lambda i: (0, 0)),
                pl.BlockSpec((n_out, m_total), lambda i: (0, 0)),
            ],
        ),
        compiler_params=pltpu.CompilerParams(
            dimension_semantics=("arbitrary",)),
        cost_estimate=cost,
    )(patches, wcat, bcat)

    # (n_out, N*M_pad) -> NCHW. Tiny (16 KiB) transpose; acceptable at toy size.
    mu = (mu2.reshape(n_out, n, m_pad)[:, :, :m_b]
          .transpose(1, 0, 2).reshape(n, n_out, oh, ow))
    sd = (sd2.reshape(n_out, n, m_pad)[:, :, :m_b]
          .transpose(1, 0, 2).reshape(n, n_out, oh, ow))
    return mu, sd


def _reference_forward(x, w_mu, b_mu, w_sg, b_sg, stride, padding):
    dn = jax.lax.conv_dimension_numbers(x.shape, w_mu.shape, ("NCHW", "OIHW", "NCHW"))
    pad = [(padding, padding), (padding, padding)]
    mu = jax.lax.conv_general_dilated(
        x, w_mu, (stride, stride), pad, dimension_numbers=dn,
        precision=jax.lax.Precision.HIGHEST) + b_mu.reshape(1, -1, 1, 1)
    sg = jax.lax.conv_general_dilated(
        x, w_sg, (stride, stride), pad, dimension_numbers=dn,
        precision=jax.lax.Precision.HIGHEST) + b_sg.reshape(1, -1, 1, 1)
    return mu, jax.nn.softplus(sg)


if __name__ == "__main__":
    # Module config: GaussianVAE2D(n_in=4, n_out=8, kernel_size=3, stride=1, padding=1)
    n_in, n_out, ksize, stride, padding = 4, 8, 3, 1, 1
    N, H, W = 2, 16, 16

    key = jax.random.PRNGKey(0)
    kx, kwm, kbm, kws, kbs = jax.random.split(key, 5)

    x = jax.random.normal(kx, (N, n_in, H, W), dtype=jnp.float32)
    # reset_parameters(): normal(0, 0.002) for both conv weights and biases.
    w_mu = 0.002 * jax.random.normal(kwm, (n_out, n_in, ksize, ksize), dtype=jnp.float32)
    b_mu = 0.002 * jax.random.normal(kbm, (n_out,), dtype=jnp.float32)
    w_sg = 0.002 * jax.random.normal(kws, (n_out, n_in, ksize, ksize), dtype=jnp.float32)
    b_sg = 0.002 * jax.random.normal(kbs, (n_out,), dtype=jnp.float32)

    mu, sd = gaussian_vae2d_forward(x, w_mu, b_mu, w_sg, b_sg,
                                    stride=stride, padding=padding)
    jax.block_until_ready((mu, sd))

    mu_ref, sd_ref = _reference_forward(x, w_mu, b_mu, w_sg, b_sg, stride, padding)
    assert mu.shape == (N, n_out, H, W) and sd.shape == (N, n_out, H, W)
    assert jnp.allclose(mu, mu_ref, atol=1e-5, rtol=1e-4)
    assert jnp.allclose(sd, sd_ref, atol=1e-5, rtol=1e-4)

    print("KERNEL_OK")
</pallas_src>

<mosaic_0001>
module attributes {stable_mosaic.version = 11 : i64} {
  func.func @_vae_head_kernel(%arg0: i32, %arg1: memref<36x512xf32, #tpu.memory_space<vmem>>, %arg2: memref<16x36xf32, #tpu.memory_space<vmem>>, %arg3: memref<16x1xf32, #tpu.memory_space<vmem>>, %arg4: memref<8x512xf32, #tpu.memory_space<vmem>>, %arg5: memref<8x512xf32, #tpu.memory_space<vmem>>) attributes {dimension_semantics = [#tpu.dimension_semantics<arbitrary>], iteration_bounds = array<i64: 1>, scalar_prefetch = 0 : i64, scratch_operands = 0 : i64, tpu.core_type = #tpu.core_type<tc>, window_params = [{pipeline_mode = #tpu.pipeline_mode<synchronous>, transform_indices = @transform_0, window_bounds = array<i64: 36, 512>}, {pipeline_mode = #tpu.pipeline_mode<synchronous>, transform_indices = @transform_1, window_bounds = array<i64: 16, 36>}, {pipeline_mode = #tpu.pipeline_mode<synchronous>, transform_indices = @transform_2, window_bounds = array<i64: 16, 1>}, {pipeline_mode = #tpu.pipeline_mode<synchronous>, transform_indices = @transform_3, window_bounds = array<i64: 8, 512>}, {pipeline_mode = #tpu.pipeline_mode<synchronous>, transform_indices = @transform_4, window_bounds = array<i64: 8, 512>}]} {
    %c0 = arith.constant 0 : index
    %c0_0 = arith.constant 0 : index
    %0 = vector.load %arg2[%c0, %c0_0] : memref<16x36xf32, #tpu.memory_space<vmem>>, vector<16x36xf32>
    %c0_1 = arith.constant 0 : index
    %c0_2 = arith.constant 0 : index
    %1 = vector.load %arg1[%c0_1, %c0_2] : memref<36x512xf32, #tpu.memory_space<vmem>>, vector<36x512xf32>
    %cst = arith.constant dense<0.000000e+00> : vector<16x512xf32>
    %2 = tpu.matmul %0, %1, %cst {dimension_numbers = #tpu.dot_dimension_numbers<[1], [0], [0], [1], [0, 0, 1, 1], [], []>, precision = #tpu.contract_precision<fp32>} : vector<16x36xf32>, vector<36x512xf32>, vector<16x512xf32> -> vector<16x512xf32>
    %c0_3 = arith.constant 0 : index
    %c0_4 = arith.constant 0 : index
    %3 = vector.load %arg3[%c0_3, %c0_4] : memref<16x1xf32, #tpu.memory_space<vmem>>, vector<16x1xf32>
    %4 = vector.broadcast %3 : vector<16x1xf32> to vector<16x512xf32>
    %5 = arith.addf %2, %4 : vector<16x512xf32>
    %6 = vector.extract_strided_slice %5 {offsets = [0, 0], sizes = [8, 512], strides = [1, 1]} : vector<16x512xf32> to vector<8x512xf32>
    %c0_5 = arith.constant 0 : index
    %c0_6 = arith.constant 0 : index
    %7 = vector.load %arg4[%c0_5, %c0_6] : memref<8x512xf32, #tpu.memory_space<vmem>>, vector<8x512xf32>
    tpu.vector_store %arg4[%c0_5, %c0_6], %6 {strides = array<i32>} : memref<8x512xf32, #tpu.memory_space<vmem>>, vector<8x512xf32>,
    %8 = vector.extract_strided_slice %5 {offsets = [8, 0], sizes = [8, 512], strides = [1, 1]} : vector<16x512xf32> to vector<8x512xf32>
    %cst_7 = arith.constant 0.000000e+00 : f32
    %9 = vector.broadcast %cst_7 : f32 to vector<8x512xf32>
    %10 = arith.maximumf %8, %9 : vector<8x512xf32>
    %11 = math.absf %8 : vector<8x512xf32>
    %cst_8 = arith.constant 0.000000e+00 : f32
    %12 = vector.broadcast %cst_8 : f32 to vector<8x512xf32>
    %13 = arith.subf %12, %11 : vector<8x512xf32>
    %14 = math.exp %13 : vector<8x512xf32>
    %15 = math.log1p %14 : vector<8x512xf32>
    %16 = arith.addf %10, %15 : vector<8x512xf32>
    %c0_9 = arith.constant 0 : index
    %c0_10 = arith.constant 0 : index
    %17 = vector.load %arg5[%c0_9, %c0_10] : memref<8x512xf32, #tpu.memory_space<vmem>>, vector<8x512xf32>
    tpu.vector_store %arg5[%c0_9, %c0_10], %16 {strides = array<i32>} : memref<8x512xf32, #tpu.memory_space<vmem>>, vector<8x512xf32>,
    return
  }
  func.func @transform_0(%arg0: i32) -> (i32, i32) {
    %c0_i32 = arith.constant 0 : i32
    %c0_i32_0 = arith.constant 0 : i32
    %c0_i32_1 = arith.constant 0 : i32
    return %c0_i32, %c0_i32_0 : i32, i32
  }
  func.func @transform_1(%arg0: i32) -> (i32, i32) {
    %c0_i32 = arith.constant 0 : i32
    %c0_i32_0 = arith.constant 0 : i32
    %c0_i32_1 = arith.constant 0 : i32
    return %c0_i32, %c0_i32_0 : i32, i32
  }
  func.func @transform_2(%arg0: i32) -> (i32, i32) {
    %c0_i32 = arith.constant 0 : i32
    %c0_i32_0 = arith.constant 0 : i32
    %c0_i32_1 = arith.constant 0 : i32
    return %c0_i32, %c0_i32_0 : i32, i32
  }
  func.func @transform_3(%arg0: i32) -> (i32, i32) {
    %c0_i32 = arith.constant 0 : i32
    %c0_i32_0 = arith.constant 0 : i32
    %c0_i32_1 = arith.constant 0 : i32
    return %c0_i32, %c0_i32_0 : i32, i32
  }
  func.func @transform_4(%arg0: i32) -> (i32, i32) {
    %c0_i32 = arith.constant 0 : i32
    %c0_i32_0 = arith.constant 0 : i32
    %c0_i32_1 = arith.constant 0 : i32
    return %c0_i32, %c0_i32_0 : i32, i32
  }
}

</mosaic_0001>

<bundles_post_ra>
// kernel: tpu_custom_call.1
= control target key start
LH: loop header
LB: loop body
LE: loop exit
PB: predicated region body
PF: predicated region fallthrough
CT: control target
= control target key end

     0   :  { %10 = vsyncpa [#allocation3], 0  ;;  %s2077_s0 = inlined_call_operand.hbm [shape: f32[36,512], index: 0, kind: input, shape index: {}]   ;;  %s2078_s1 = inlined_call_operand.vmem [shape: f32[16,36], index: 1, kind: input, shape index: {}]   ;;  %s2079_s2 = inlined_call_operand.vmem [shape: f32[16,1], index: 2, kind: input, shape index: {}]   ;;  %s2080_s3 = inlined_call_operand.hbm [shape: f32[8,512], index: 3, kind: output, shape index: {0}]   ;;  %s2081_s4 = inlined_call_operand.hbm [shape: f32[8,512], index: 4, kind: output, shape index: {1}]  }
   0x1   :  { %11 = vsyncpa [#allocation4], 0 }
   0x2   :  { %12 = vsyncpa [#allocation7], 0  ;;  %s1659_s15 = smov [#allocation2]   ;;  %s1587_s19 = scalar_lea.hbm %s2077_s0, 2560 }
   0x3   :  { %s18_s16 = sshll.u32 %s1659_s15, 4  ;;  %p1588_p0 = scmp.ne.s32.totalorder %s2077_s0, %s1587_s19  ;;  %s19_s16 = int_to_ptr.vmem [resolvable:$true] %s18_s16 }
   0x4   :  { %p1591_p1 = scmp.lt.u32.totalorder %s1587_s19, %s2077_s0 }
   0x6   :  { %p1593_p2 = pnand %p1591_p1, %p1588_p0 }
   0x8   :  { %1596 = shalt.err (!%p1593_p2)
}
   0x9   :  { %s1597_s24 = scalar_lea.vmem %s19_s16, 2560  ;;  %p1602_p4 = scmp.lt.s32.totalorder %s19_s16, %s19_s16 }
   0xa   :  { %p1598_p3 = scmp.ne.s32.totalorder %s19_s16, %s1597_s24  ;;  %p1603_p5 = scmp.lt.s32.totalorder %s1597_s24, %s1597_s24 }
   0xc   :  { %p1604_p6 = por %p1603_p5, %p1602_p4 }
   0xe   :  { %p1605_p7 = pnand %p1604_p6, %p1598_p3 }
  0x10   :  { %1608 = shalt.err (!%p1605_p7)
}
  0x11   :  { %s1660_s25 = smov 512   ;;  %s1661_s26 = smov 32  }
  0x12   :  { %24 = dma.hbm_to_vmem [thread:$0]  %s2077_s0, 2560, %s19_s16, [#allocation3], %s1660_s25, %s1660_s25, %s1661_s26  }
  0x13   :  { %1653 = dma.done.wait [#allocation3], 2560  }
  0x14   :  { %1654 = vsyncadd [#allocation3], 4294964736  ;;  %v1662_v0 = vmov 0.0   ;;  %v1663_v1 = vmov 0   ;;  %v35_v2 = vld [vmem:[#allocation2 + $0x8] sm:$0xff]  ;;  %v37_v4 = vld [vmem:[#allocation2 + $0x18] sm:$0xff] }
  0x15   :  { %160 = vmatprep.mubr.f32.mxu0 %v1662_v0  ;;  %778 = vmatprep.mubr.f32.mxu1 %v1662_v0  ;;  %v39_v3 = vld [vmem:[#allocation2 + $0x28] sm:$0xff]  ;;  %vm73_vm0 = vcmask 1043456   ;;  %v86_v5 = vand.u32 4294901760, %v35_v2  ;;  %v41_v7 = vld [vmem:[#allocation2 + $0x38] sm:$0xff]  ;;  %v704_v8 = vand.u32 4294901760, %v37_v4  ;;  %v34_v9 = vld [vmem:[#allocation2] sm:$0xff] }
  0x16   :  { %1570 = vset.pattern.permute.xlu0 %v1663_v1  ;;  %v90_v6 = vand.u32 4294901760, %v39_v3  ;;  %v38_v10 = vld [vmem:[#allocation2 + $0x20] sm:$0xff]  ;;  %v708_v11 = vand.u32 4294901760, %v41_v7  ;;  %v88_v12 = vand.u32 4294901760, %v34_v9  ;;  %v36_v14 = vld [vmem:[#allocation2 + $0x10] sm:$0xff]  ;;  %v43_v16 = vld [vmem:[#allocation2 + $0x48] sm:$0xff] }
  0x17   :  { %v92_v13 = vand.u32 4294901760, %v38_v10  ;;  %v40_v15 = vld [vmem:[#allocation2 + $0x30] sm:$0xff]  ;;  %v1707_v18 = vsub.f32 %v35_v2, %v86_v5  ;;  %v1711_v20 = vsub.f32 %v37_v4, %v704_v8  ;;  %v47_v21 = vld [vmem:[#allocation2 + $0x68] sm:$0xff]  ;;  %v45_v22 = vld [vmem:[#allocation2 + $0x58] sm:$0xff]  ;;  %vm66_vm1 = vcmask 293888  }
  0x18   :  { %v1705_v17 = vpack.c.bf16 %v90_v6, %v86_v5  ;;  %v1709_v19 = vsub.f32 %v39_v3, %v90_v6  ;;  %v49_v23 = vld [vmem:[#allocation2 + $0x78] sm:$0xff]  ;;  %v1713_v24 = vpack.c.bf16 %v708_v11, %v704_v8  ;;  %v1715_v25 = vsub.f32 %v41_v7, %v708_v11  ;;  %v42_v28 = vld [vmem:[#allocation2 + $0x40] sm:$0xff]  ;;  %v44_v38 = vld [vmem:[#allocation2 + $0x50] sm:$0xff] }
  0x19   :  { %v1717_v26 = vpack.c.bf16 %v92_v13, %v88_v12  ;;  %v1719_v27 = vsub.f32 %v34_v9, %v88_v12  ;;  %v1722_v29 = vsub.f32 %v38_v10, %v92_v13  ;;  %v706_v30 = vand.u32 4294901760, %v36_v14  ;;  %v46_v33 = vld [vmem:[#allocation2 + $0x60] sm:$0xff]  ;;  %v48_v39 = vld [vmem:[#allocation2 + $0x70] sm:$0xff]  ;;  %v51_v44 = vld [vmem:[#allocation2 + $0x88] sm:$0xf] }
  0x1a   :  { %1420 = vmatprep.subr.bf16.mxu0 %v1705_v17  ;;  %v710_v31 = vand.u32 4294901760, %v40_v15  ;;  %v94_v32 = vand.u32 4294901760, %v43_v16  ;;  %1468 = vmatprep.subr.bf16.mxu1 %v1713_v24  ;;  %v98_v34 = vand.u32 4294901760, %v47_v21  ;;  %v712_v35 = vand.u32 4294901760, %v45_v22  ;;  %v53_v45 = vld [vmem:[#allocation2 + $0x98] sm:$0xf] }
  0x1b   :  { %1422 = vmatpush1.bf16.msra.mxu0 %v1717_v26  ;;  %v716_v36 = vand.u32 4294901760, %v49_v23  ;;  %v96_v37 = vand.u32 4294901760, %v42_v28  ;;  %v1728_v41 = vsub.f32 %v36_v14, %v706_v30  ;;  %v50_v46 = vld [vmem:[#allocation2 + $0x80] sm:$0xf]  ;;  %v55_v51 = vld [vmem:[%s2079_s2 + $0x8] sm:$0xff]  ;;  %v100_v53 = vand.u32 4294901760, %v46_v33 }
  0x1c   :  { %v1726_v40 = vpack.c.bf16 %v710_v31, %v706_v30  ;;  %v1730_v42 = vsub.f32 %v40_v15, %v710_v31  ;;  %v1732_v43 = vsub.f32 %v43_v16, %v94_v32  ;;  %v1734_v47 = vpack.c.bf16 %v98_v34, %v94_v32  ;;  %v52_v56 = vld [vmem:[#allocation2 + $0x90] sm:$0xf]  ;;  %63 = vperm.xlu0 %1570, %v55_v51   ;;  %v54_v61 = vld [vmem:[%s2079_s2] sm:$0xff] }
  0x1d   :  { %v1736_v48 = vsub.f32 %v47_v21, %v98_v34  ;;  %v1738_v49 = vpack.c.bf16 %v716_v36, %v712_v35  ;;  %v1740_v50 = vsub.f32 %v45_v22, %v712_v35  ;;  %v1746_v52 = vsub.f32 %v49_v23, %v716_v36  ;;  %v32_v3 = vld [vmem:[%s2078_s1] sm:$0xff] }
  0x1e   :  { %1470 = vmatpush1.bf16.msra.mxu1 %v1726_v40  ;;  %v1748_v54 = vsub.f32 %v42_v28, %v96_v37  ;;  %v714_v55 = vand.u32 4294901760, %v44_v38  ;;  %1424 = vmatprep.subr.bf16.mxu0 %v1734_v47  ;;  %v718_v57 = vand.u32 4294901760, %v48_v39  ;;  %v1753_v58 = vsel %vm73_vm0, %v51_v44, 0 }
  0x1f   :  { %1472 = vmatprep.subr.bf16.mxu1 %v1738_v49  ;;  %v1756_v59 = vsel %vm73_vm0, %v53_v45, 0  ;;  %v75_v60 = vsel %vm73_vm0, %v50_v46, 0  ;;  %v1762_v62 = vpack.c.bf16 %v100_v53, %v96_v37  ;;  %v1764_v63 = vsub.f32 %v46_v33, %v100_v53 }
  0x20   :  { %v1766_v1 = vsub.f32 %v44_v38, %v714_v55  ;;  %v1769_v2 = vand.u32 4294901760, %v1753_v58  ;;  %v1774_v4 = vpack.c.bf16 %v718_v57, %v714_v55  ;;  %v1776_v5 = vsub.f32 %v48_v39, %v718_v57  ;;  %58 = vperm.xlu0 %1570, %v54_v61  }
  0x21   :  { %v1779_v6 = vand.u32 4294901760, %v1756_v59  ;;  %v1781_v7 = vand.u32 4294901760, %v75_v60  ;;  %1426 = vmatpush1.bf16.msra.mxu0 %v1762_v62  ;;  %v81_v8 = vsel %vm73_vm0, %v52_v56, 0  ;;  %v185_v9 = vand.u32 4294901760, %v1707_v18 }
  0x22   :  { %v197_v10 = vand.u32 4294901760, %v1709_v19  ;;  %v803_v11 = vand.u32 4294901760, %v1711_v20  ;;  %1474 = vmatpush1.bf16.msra.mxu1 %v1774_v4  ;;  %103 = vmatprep.subr.mxu0 %v1769_v2  ;;  %v1793_v13 = vand.u32 4294901760, %v81_v8  ;;  %v815_v14 = vand.u32 4294901760, %v1715_v25 }
  0x23   :  { %v1791_v12 = vsub.f32 %v75_v60, %v1781_v7  ;;  %v68_v15 = vsel %vm66_vm1, %v32_v3, 0  ;;  %721 = vmatprep.subr.mxu1 %v1779_v6  ;;  %v186_v16 = vsub.f32 %v1707_v18, %v185_v9  ;;  %v191_v31 = vand.u32 4294901760, %v1719_v27 }
  0x24   :  { %v198_v21 = vsub.f32 %v1709_v19, %v197_v10  ;;  %v804_v22 = vsub.f32 %v1711_v20, %v803_v11  ;;  %v1807_v23 = vand.u32 4294901760, %v68_v15  ;;  %v1810_v28 = vsub.f32 %v81_v8, %v1793_v13 }
  0x25   :  { %v816_v30 = vsub.f32 %v1715_v25, %v815_v14  ;;  %v203_v32 = vand.u32 4294901760, %v1722_v29  ;;  %105 = vmatpush1.msra.mxu0 %v1781_v7  ;;  %v187_v33 = vand.u32 4294901760, %v186_v16  ;;  %v192_v38 = vsub.f32 %v1719_v27, %v191_v31 }
  0x26   :  { %v199_v34 = vand.u32 4294901760, %v198_v21  ;;  %v805_v35 = vand.u32 4294901760, %v804_v22  ;;  %v1819_v36 = vsub.f32 %v68_v15, %v1807_v23  ;;  %723 = vmatpush1.msra.mxu1 %v1793_v13  ;;  %v809_v44 = vand.u32 4294901760, %v1728_v41 }
  0x27   :  { %v817_v37 = vand.u32 4294901760, %v816_v30  ;;  %v204_v39 = vsub.f32 %v1722_v29, %v203_v32  ;;  %v821_v51 = vand.u32 4294901760, %v1730_v42  ;;  %v209_v53 = vand.u32 4294901760, %v1732_v43 }
  0x28   :  { %v1427_v45 = vpack.c.bf16 %v199_v34, %v187_v33  ;;  %v1830_v46 = vand.u32 4294901760, %v1819_v36  ;;  %v193_v56 = vand.u32 4294901760, %v192_v38  ;;  %v810_v60 = vsub.f32 %v1728_v41, %v809_v44 }
  0x29   :  { %v1475_v55 = vpack.c.bf16 %v817_v37, %v805_v35  ;;  %v205_v57 = vand.u32 4294901760, %v204_v39  ;;  %v822_v3 = vsub.f32 %v1730_v42, %v821_v51  ;;  %v210_v8 = vsub.f32 %v1732_v43, %v209_v53 }
  0x2a   :  { %1428 = vmatprep.subr.bf16.mxu0 %v1427_v45  ;;  %v164_v61 = vsub.f32 %v1819_v36, %v1830_v46  ;;  %v2084_v15 = vand.u32 4294901760, %v1736_v48  ;;  %v811_v21 = vand.u32 4294901760, %v810_v60  ;;  %v2082_v22 = vand.u32 4294901760, %v1740_v50 }
  0x2b   :  { %1476 = vmatprep.subr.bf16.mxu1 %v1475_v55  ;;  %v1429_v16 = vpack.c.bf16 %v205_v57, %v193_v56  ;;  %v2083_v30 = vand.u32 4294901760, %v1746_v52  ;;  %v823_v34 = vand.u32 4294901760, %v822_v3  ;;  %v211_v35 = vand.u32 4294901760, %v210_v8  ;;  %v33_v56 = vld [vmem:[%s2078_s1 + $0x8] sm:$0xff]  ;;  %s1664_s1 = smov [#allocation5]  }
  0x2c   :  { %v165_v33 = vand.u32 4294901760, %v164_v61  ;;  %v222_v37 = vsub.f32 %v1736_v48, %v2084_v15  ;;  %v828_v38 = vsub.f32 %v1740_v50, %v2082_v22  ;;  %v215_v45 = vand.u32 4294901760, %v1748_v54  ;;  %s1396_s9 = sshll.u32 %s1664_s1, 4  ;;  %s1397_s9 = int_to_ptr.vmem [resolvable:$true] %s1396_s9 }
  0x2d   :  { %v840_v39 = vsub.f32 %v1746_v52, %v2083_v30  ;;  %v2085_v55 = vand.u32 4294901760, %v1764_v63  ;;  %v1477_v57 = vpack.c.bf16 %v823_v34, %v811_v21  ;;  %v2086_v61 = vand.u32 4294901760, %v1766_v1  ;;  %s1609_s10 = scalar_lea.vmem %s1397_s9, 512  ;;  %p1614_p9 = scmp.lt.s32.totalorder %s1397_s9, %s1397_s9 }
  0x2e   :  { %166 = vmatmul.mubr.f32.vlgmr.msra.gmra.mrb[0].mxu0 %v165_v33  ;;  %784 = vmatmul.mubr.f32.vlgmr.msra.gmra.mrb[0].mxu1 %v165_v33  ;;  %v223_v60 = vand.u32 4294901760, %v222_v37  ;;  %v2087_v3 = vand.u32 4294901760, %v1776_v5  ;;  %v829_v8 = vand.u32 4294901760, %v828_v38  ;;  %v216_v30 = vsub.f32 %v1748_v54, %v215_v45  ;;  %p1610_p8 = scmp.ne.s32.totalorder %s1397_s9, %s1609_s10  ;;  %p1615_p10 = scmp.lt.s32.totalorder %s1609_s10, %s1609_s10 }
  0x2f   :  { %1430 = vmatpush1.bf16.msra.mxu0 %v1429_v16  ;;  %v841_v22 = vand.u32 4294901760, %v840_v39  ;;  %v228_v15 = vsub.f32 %v1764_v63, %v2085_v55  ;;  %171 = vmatprep.mubr.f32.mxu0 %v1662_v0  ;;  %v834_v33 = vsub.f32 %v1766_v1, %v2086_v61  ;;  %v71_v34 = vsel %vm66_vm1, %v33_v56, 0 }
  0x30   :  { %1478 = vmatpush1.bf16.msra.mxu1 %v1477_v57  ;;  %v1431_v21 = vpack.c.bf16 %v223_v60, %v211_v35  ;;  %v846_v16 = vsub.f32 %v1776_v5, %v2087_v3  ;;  %789 = vmatprep.mubr.f32.mxu1 %v1662_v0  ;;  %v217_v38 = vand.u32 4294901760, %v216_v30  ;;  %v1879_v55 = vand.u32 4294901760, %v71_v34  ;;  %p1616_p11 = por %p1615_p10, %p1614_p9 }
  0x31   :  { %v1479_v37 = vpack.c.bf16 %v841_v22, %v829_v8  ;;  %v229_v39 = vand.u32 4294901760, %v228_v15  ;;  %v835_v57 = vand.u32 4294901760, %v834_v33  ;;  %v1883_v60 = vsub.f32 %v1753_v58, %v1769_v2 }
  0x32   :  { %1432 = vmatprep.subr.bf16.mxu0 %v1431_v21  ;;  %v847_v35 = vand.u32 4294901760, %v846_v16  ;;  %v1887_v61 = vsub.f32 %v1756_v59, %v1779_v6  ;;  %v1890_v56 = vsub.f32 %v71_v34, %v1879_v55  ;;  %v2089_v15 = vand.u32 4294901760, %v1791_v12  ;;  %p1617_p12 = pnand %p1616_p11, %p1610_p8 }
  0x33   :  { %1480 = vmatprep.subr.bf16.mxu1 %v1479_v37  ;;  %v1433_v3 = vpack.c.bf16 %v229_v39, %v217_v38  ;;  %v2088_v22 = vand.u32 4294901760, %v1810_v28  ;;  %v233_v8 = vand.u32 4294901760, %v1883_v60 }
  0x34   :  { %v1481_v30 = vpack.c.bf16 %v847_v35, %v835_v57  ;;  %v851_v21 = vand.u32 4294901760, %v1887_v61  ;;  %v1897_v58 = vand.u32 4294901760, %v1890_v56  ;;  %v240_v59 = vsub.f32 %v1791_v12, %v2089_v15 }
  0x35   :  { %1434 = vmatpush1.bf16.msra.mxu0 %v1433_v3  ;;  %v858_v33 = vsub.f32 %v1810_v28, %v2088_v22  ;;  %v234_v16 = vsub.f32 %v1883_v60, %v233_v8  ;;  %v1435_v22 = vpack.c.bf16 %v1709_v19, %v1707_v18  ;;  %v1437_v15 = vpack.c.bf16 %v1722_v29, %v1719_v27 }
  0x36   :  { %1482 = vmatpush1.bf16.msra.mxu1 %v1481_v30  ;;  %v852_v3 = vsub.f32 %v1887_v61, %v851_v21  ;;  %v175_v34 = vsub.f32 %v1890_v56, %v1897_v58  ;;  %v241_v39 = vand.u32 4294901760, %v240_v59  ;;  %v1483_v30 = vpack.c.bf16 %v1715_v25, %v1711_v20 }
  0x37   :  { %v235_v37 = vand.u32 4294901760, %v234_v16  ;;  %v859_v57 = vand.u32 4294901760, %v858_v33  ;;  %v1485_v59 = vpack.c.bf16 %v1730_v42, %v1728_v41  ;;  %v1439_v33 = vpack.c.bf16 %v1736_v48, %v1732_v43 }
  0x38   :  { %v853_v38 = vand.u32 4294901760, %v852_v3  ;;  %v176_v35 = vand.u32 4294901760, %v175_v34  ;;  %v1487_v16 = vpack.c.bf16 %v1746_v52, %v1740_v50  ;;  %v1441_v3 = vpack.c.bf16 %v1764_v63, %v1748_v54 }
  0x39   :  { %236 = vmatprep.subr.mxu0 %v235_v37  ;;  %v1501_v18 = vpack.c.bf16 %v821_v51, %v809_v44  ;;  %v2090_v19 = vand.u32 4294901760, %v1736_v48  ;;  %v2091_v25 = vand.u32 4294901760, %v1740_v50  ;;  %v2092_v27 = vand.u32 4294901760, %v1746_v52 }
  0x3a   :  { %854 = vmatprep.subr.mxu1 %v853_v38  ;;  %177 = vmatmul.mubr.f32.gmra.mrb[2].mxu0 %v176_v35  ;;  %v2093_v41 = vand.u32 4294901760, %v1764_v63  ;;  %v2094_v43 = vand.u32 4294901760, %v1766_v1  ;;  %v2095_v48 = vand.u32 4294901760, %v1776_v5  ;;  %v2096_v52 = vand.u32 4294901760, %v1791_v12 }
  0x3b   :  { %795 = vmatmul.mubr.f32.gmra.mrb[2].mxu1 %v176_v35  ;;  %242 = vmatpush1.msra.mxu0 %v241_v39  ;;  %v1455_v20 = vpack.c.bf16 %v2090_v19, %v209_v53  ;;  %v1503_v29 = vpack.c.bf16 %v2092_v27, %v2091_v25  ;;  %v2097_v54 = vand.u32 4294901760, %v1810_v28 }
  0x3c   :  { %860 = vmatpush1.msra.mxu1 %v859_v57  ;;  %297 = vmatprep.mubr.f32.mxu0 %v1662_v0  ;;  %v1457_v42 = vpack.c.bf16 %v2093_v41, %v215_v45  ;;  %v1505_v50 = vpack.c.bf16 %v2095_v48, %v2094_v43 }
  0x3d   :  { %1436 = vmatprep.subr.bf16.mxu0 %v1435_v22  ;;  %915 = vmatprep.mubr.f32.mxu1 %v1662_v0  ;;  %v1489_v22 = vpack.c.bf16 %v1776_v5, %v1766_v1 }
  0x3e   :  { %1484 = vmatprep.subr.bf16.mxu1 %v1483_v30  ;;  %299 = vmatmul.mubr.f32.vlgmr.msra.gmra.mrb[0].mxu0 %v1807_v23 }
  0x3f   :  { %917 = vmatmul.mubr.f32.vlgmr.msra.gmra.mrb[0].mxu1 %v1807_v23  ;;  %1438 = vmatpush1.bf16.msra.mxu0 %v1437_v15  ;;  %v1499_v15 = vpack.c.bf16 %v815_v14, %v803_v11 }
  0x40   :  { %1486 = vmatpush1.bf16.msra.mxu1 %v1485_v59  ;;  %1440 = vmatprep.subr.bf16.mxu0 %v1439_v33 }
  0x41   :  { %1488 = vmatprep.subr.bf16.mxu1 %v1487_v16  ;;  %304 = vmatprep.mubr.f32.mxu0 %v1662_v0 }
  0x42   :  { %922 = vmatprep.mubr.f32.mxu1 %v1662_v0  ;;  %306 = vmatmul.mubr.f32.gmra.mrb[2].mxu0 %v1879_v55 }
  0x43   :  { %924 = vmatmul.mubr.f32.gmra.mrb[2].mxu1 %v1879_v55  ;;  %1442 = vmatpush1.bf16.msra.mxu0 %v1441_v3 }
  0x44   :  { %1490 = vmatpush1.bf16.msra.mxu1 %v1489_v22  ;;  %338 = vmatprep.subr.mxu0 %v1883_v60 }
  0x45   :  { %956 = vmatprep.subr.mxu1 %v1887_v61  ;;  %396 = vmatprep.mubr.f32.mxu0 %v1662_v0 }
  0x46   :  { %1014 = vmatprep.mubr.f32.mxu1 %v1662_v0 }
  0x47   :  { %341 = vmatpush1.msra.mxu0 %v1791_v12 }
  0x48   :  { %959 = vmatpush1.msra.mxu1 %v1810_v28  ;;  %1444 = vmatprep.subr.bf16.mxu0 %v1705_v17 }
  0x49   :  { %1492 = vmatprep.subr.bf16.mxu1 %v1713_v24  ;;  %399 = vmatmul.mubr.f32.vlgmr.msra.gmra.mrb[0].mxu0 %v1819_v36 }
  0x4a   :  { %1017 = vmatmul.mubr.f32.vlgmr.msra.gmra.mrb[0].mxu1 %v1819_v36  ;;  %1446 = vmatpush1.bf16.msra.mxu0 %v1717_v26  ;;  %v1451_v36 = vpack.c.bf16 %v197_v10, %v185_v9 }
  0x4b   :  { %1494 = vmatpush1.bf16.msra.mxu1 %v1726_v40  ;;  %1448 = vmatprep.subr.bf16.mxu0 %v1734_v47 }
  0x4c   :  { %1496 = vmatprep.subr.bf16.mxu1 %v1738_v49  ;;  %404 = vmatprep.mubr.f32.mxu0 %v1662_v0 }
  0x4d   :  { %1022 = vmatprep.mubr.f32.mxu1 %v1662_v0  ;;  %407 = vmatmul.mubr.f32.gmra.mrb[2].mxu0 %v1890_v56 }
  0x4e   :  { %1025 = vmatmul.mubr.f32.gmra.mrb[2].mxu1 %v1890_v56  ;;  %1450 = vmatpush1.bf16.msra.mxu0 %v1762_v62  ;;  %v1453_v56 = vpack.c.bf16 %v203_v32, %v191_v31 }
  0x4f   :  { %1498 = vmatpush1.bf16.msra.mxu1 %v1774_v4  ;;  %430 = vmatprep.subr.mxu0 %v1769_v2 }
  0x50   :  { %1048 = vmatprep.subr.mxu1 %v1779_v6  ;;  %487 = vmatprep.mubr.f32.mxu0 %v1662_v0 }
  0x51   :  { %1105 = vmatprep.mubr.f32.mxu1 %v1662_v0 }
  0x52   :  { %432 = vmatpush1.msra.mxu0 %v1781_v7 }
  0x53   :  { %1050 = vmatpush1.msra.mxu1 %v1793_v13  ;;  %1452 = vmatprep.subr.bf16.mxu0 %v1451_v36 }
  0x54   :  { %1500 = vmatprep.subr.bf16.mxu1 %v1499_v15  ;;  %491 = vmatmul.mubr.f32.vlgmr.msra.gmra.mrb[0].mxu0 %v1830_v46 }
  0x55   :  { %1109 = vmatmul.mubr.f32.vlgmr.msra.gmra.mrb[0].mxu1 %v1830_v46  ;;  %1454 = vmatpush1.bf16.msra.mxu0 %v1453_v56 }
  0x56   :  { %1502 = vmatpush1.bf16.msra.mxu1 %v1501_v18  ;;  %1456 = vmatprep.subr.bf16.mxu0 %v1455_v20 }
  0x57   :  { %1504 = vmatprep.subr.bf16.mxu1 %v1503_v29  ;;  %496 = vmatprep.mubr.f32.mxu0 %v1662_v0 }
  0x58   :  { %1114 = vmatprep.mubr.f32.mxu1 %v1662_v0  ;;  %500 = vmatmul.mubr.f32.gmra.mrb[2].mxu0 %v1897_v58 }
  0x59   :  { %1118 = vmatmul.mubr.f32.gmra.mrb[2].mxu1 %v1897_v58  ;;  %1458 = vmatpush1.bf16.msra.mxu0 %v1457_v42 }
  0x5a   :  { %1506 = vmatpush1.bf16.msra.mxu1 %v1505_v50  ;;  %541 = vmatprep.subr.mxu0 %v233_v8 }
  0x5b   :  { %1159 = vmatprep.subr.mxu1 %v851_v21  ;;  %600 = vmatprep.mubr.f32.mxu0 %v1662_v0 }
  0x5c   :  { %1218 = vmatprep.mubr.f32.mxu1 %v1662_v0 }
  0x5d   :  { %545 = vmatpush1.msra.mxu0 %v2096_v52 }
  0x5e   :  { %1163 = vmatpush1.msra.mxu1 %v2097_v54  ;;  %1460 = vmatprep.subr.bf16.mxu0 %v1705_v17 }
  0x5f   :  { %1508 = vmatprep.subr.bf16.mxu1 %v1713_v24  ;;  %602 = vmatmul.mubr.f32.vlgmr.msra.gmra.mrb[0].mxu0 %v1807_v23 }
  0x60   :  { %1220 = vmatmul.mubr.f32.vlgmr.msra.gmra.mrb[0].mxu1 %v1807_v23  ;;  %1462 = vmatpush1.bf16.msra.mxu0 %v1717_v26 }
  0x61   :  { %1510 = vmatpush1.bf16.msra.mxu1 %v1726_v40  ;;  %1464 = vmatprep.subr.bf16.mxu0 %v1734_v47 }
  0x62   :  { %1512 = vmatprep.subr.bf16.mxu1 %v1738_v49  ;;  %607 = vmatprep.mubr.f32.mxu0 %v1662_v0 }
  0x63   :  { %1225 = vmatprep.mubr.f32.mxu1 %v1662_v0  ;;  %609 = vmatmul.mubr.f32.gmra.mrb[2].mxu0 %v1879_v55 }
  0x64   :  { %1227 = vmatmul.mubr.f32.gmra.mrb[2].mxu1 %v1879_v55  ;;  %1466 = vmatpush1.bf16.msra.mxu0 %v1762_v62 }
  0x65   :  { %1514 = vmatpush1.bf16.msra.mxu1 %v1774_v4  ;;  %632 = vmatprep.subr.mxu0 %v1769_v2 }
  0x66   :  { %1250 = vmatprep.subr.mxu1 %v1779_v6  ;;  %689 = vmatprep.mubr.f32.mxu0 %v1662_v0 }
  0x67   :  { %1307 = vmatprep.mubr.f32.mxu1 %v1662_v0 }
  0x68   :  { %634 = vmatpush1.msra.mxu0 %v1781_v7 }
  0x69   :  { %1252 = vmatpush1.msra.mxu1 %v1793_v13  ;;  %691 = vmatmul.mubr.f32.vlgmr.msra.gmra.mrb[0].mxu0 %v1807_v23 }
  0x6a   :  { %1309 = vmatmul.mubr.f32.vlgmr.msra.gmra.mrb[0].mxu1 %v1807_v23  ;;  %696 = vmatprep.mubr.f32.mxu0 %v1662_v0 }
  0x6b   :  { %1314 = vmatprep.mubr.f32.mxu1 %v1662_v0 }
  0x6d   :  { %698 = vmatmul.mubr.f32.gmra.mrb[2].mxu0 %v1879_v55 }
  0x6e   :  { %1316 = vmatmul.mubr.f32.gmra.mrb[2].mxu1 %v1879_v55 }
  0x9b   :  { %v64_v17 = vpop.permute.xlu0 %63 }
  0x9f   :  { %v59_v24 = vpop.permute.xlu0 %58 }
 0x13c   :  { %v692_v26 = vpop.f32.mrb[0].mxu0 }
 0x13d   :  { %v1310_v40 = vpop.f32.mrb[0].mxu1  ;;  %v1515_v47 = vadd.f32 %v692_v26, %v59_v24  ;;  %v694_v62 = vpop.f32.mrb[1].mxu0 }
 0x13e   :  { %v1519_v49 = vadd.f32 %v1310_v40, %v59_v24  ;;  %v1312_v63 = vpop.f32.mrb[1].mxu1  ;;  %v1516_v1 = vadd.f32 %v694_v62, %v59_v24 }
 0x13f   :  { %v1520_v2 = vadd.f32 %v1312_v63, %v59_v24  ;;  %1322 = vst [vmem:[#allocation5] sm:$0xff] %v1515_v47 }
 0x140   :  { %1324 = vst [vmem:[#allocation5 + $0x10] sm:$0xff] %v1519_v49  ;;  %1323 = vst [vmem:[#allocation5 + $0x8] sm:$0xff] %v1516_v1  ;;  %v699_v0 = vpop.f32.mrb[2].mxu0 }
 0x141   :  { %1325 = vst [vmem:[#allocation5 + $0x18] sm:$0xff] %v1520_v2  ;;  %v1317_v4 = vpop.f32.mrb[2].mxu1  ;;  %v2037_v5 = vadd.f32 %v699_v0, %v64_v17  ;;  %v701_v7 = vpop.f32.mrb[3].mxu0 }
 0x142   :  { %v2039_v6 = vadd.f32 %v1317_v4, %v64_v17  ;;  %v1319_v9 = vpop.f32.mrb[3].mxu1 }
 0x143   :  { %1620 = shalt.err (!%p1617_p12)
}
 0x144   :  { %s1621_s13 = scalar_lea.hbm %s2080_s3, 512 }
 0x145   :  { %p1622_p13 = scmp.ne.s32.totalorder %s2080_s3, %s1621_s13  ;;  %p1625_p0 = scmp.lt.u32.totalorder %s1621_s13, %s2080_s3 }
 0x147   :  { %p1627_p1 = pnand %p1625_p0, %p1622_p13 }
 0x149   :  { %1630 = shalt.err (!%p1627_p1)
}
 0x14a   :  { %1399 = dma.vmem_to_hbm [thread:$0]  %s1397_s9, 512, %s2080_s3, [#allocation4]   ;;  %v2053_v10 = vadd.f32 %v701_v7, %v64_v17  ;;  %v2055_v11 = vadd.f32 %v1319_v9, %v64_v17  ;;  %v1330_v12 = vand.u32 2147483647, %v2037_v5  ;;  %v1332_v13 = vand.u32 2147483647, %v2039_v6 }
 0x14b   :  { %v1326_v36 = vmax.f32 %v2037_v5, 0.0  ;;  %v1328_v20 = vmax.f32 %v2039_v6, 0.0  ;;  %s1665_s3 = smov [#allocation6]  }
 0x14c   :  { %v1331_v14 = vand.u32 2147483647, %v2053_v10  ;;  %v1333_v23 = vand.u32 2147483647, %v2055_v11  ;;  %v1334_v28 = vsub.f32 0.0, %v1330_v12  ;;  %v1336_v31 = vsub.f32 0.0, %v1332_v13 }
 0x14d   :  { %v1327_v24 = vmax.f32 %v2053_v10, 0.0  ;;  %s1406_s20 = sshll.u32 %s1665_s3, 4  ;;  %v1329_v63 = vmax.f32 %v2055_v11, 0.0  ;;  %s1407_s20 = int_to_ptr.vmem [resolvable:$true] %s1406_s20 }
 0x14e   :  { %v1335_v32 = vsub.f32 0.0, %v1331_v14  ;;  %v1337_v44 = vsub.f32 0.0, %v1333_v23  ;;  %v1338_v46 = vmul.f32 1.442695, %v1334_v28  ;;  %v1342_v51 = vmul.f32 1.442695, %v1336_v31  ;;  %p1636_p3 = scmp.lt.s32.totalorder %s1407_s20, %s1407_s20 }
 0x14f   :  { %s1631_s21 = scalar_lea.vmem %s1407_s20, 512 }
 0x150   :  { %v1340_v53 = vmul.f32 1.442695, %v1335_v32  ;;  %v1344_v45 = vmul.f32 1.442695, %v1337_v44  ;;  %1571 = vpow2.f32 %v1338_v46  ;;  %p1632_p2 = scmp.ne.s32.totalorder %s1407_s20, %s1631_s21  ;;  %p1637_p4 = scmp.lt.s32.totalorder %s1631_s21, %s1631_s21 }
 0x151   :  { %1573 = vpow2.f32 %v1342_v51 }
 0x152   :  { %1575 = vpow2.f32 %v1340_v53  ;;  %p1638_p5 = por %p1637_p4, %p1636_p3 }
 0x153   :  { %1577 = vpow2.f32 %v1344_v45 }
 0x154   :  { %p1639_p6 = pnand %p1638_p5, %p1632_p2 }
 0x15a   :  { %v1572_v55 = vpop.eup %1571 }
 0x15b   :  { %v1574_v61 = vpop.eup %1573  ;;  %v1346_v60 = vadd.f32 1.0, %v1572_v55  ;;  %v1349_v38 = vmul.f32 -0.5, %v1572_v55  ;;  %v1352_v59 = vand.u32 2147483647, %v1572_v55 }
 0x15c   :  { %v1576_v8 = vpop.eup %1575  ;;  %v1364_v21 = vadd.f32 1.0, %v1574_v61  ;;  %v1367_v39 = vmul.f32 -0.5, %v1574_v61  ;;  %v1370_v16 = vand.u32 2147483647, %v1574_v61 }
 0x15d   :  { %v1578_v58 = vpop.eup %1577  ;;  %1579 = vlog2.f32 %v1346_v60  ;;  %v1355_v34 = vadd.f32 1.0, %v1576_v8  ;;  %v1358_v57 = vmul.f32 -0.5, %v1576_v8  ;;  %v1350_v35 = vadd.f32 1.0, %v1349_v38 }
 0x15e   :  { %1581 = vlog2.f32 %v1364_v21  ;;  %v1373_v37 = vadd.f32 1.0, %v1578_v58  ;;  %v1376_v30 = vmul.f32 -0.5, %v1578_v58  ;;  %v1368_v33 = vadd.f32 1.0, %v1367_v39 }
 0x15f   :  { %1583 = vlog2.f32 %v1355_v34  ;;  %v1359_v3 = vadd.f32 1.0, %v1358_v57  ;;  %v1361_v15 = vand.u32 2147483647, %v1576_v8  ;;  %v1351_v19 = vmul.f32 %v1572_v55, %v1350_v35 }
 0x160   :  { %1585 = vlog2.f32 %v1373_v37  ;;  %v1377_v25 = vadd.f32 1.0, %v1376_v30  ;;  %vm1353_vm2 = vcmp.lt.f32.partialorder %v1352_v59, 0.0004427343  ;;  %v1369_v41 = vmul.f32 %v1574_v61, %v1368_v33 }
 0x161   :  { %v1379_v42 = vand.u32 2147483647, %v1578_v58  ;;  %vm1371_vm3 = vcmp.lt.f32.partialorder %v1370_v16, 0.0004427343  ;;  %v1360_v50 = vmul.f32 %v1576_v8, %v1359_v3  ;;  %vm1362_vm4 = vcmp.lt.f32.partialorder %v1361_v15, 0.0004427343 }
 0x162   :  { %v1378_v49 = vmul.f32 %v1578_v58, %v1377_v25 }
 0x163   :  { %vm1380_vm5 = vcmp.lt.f32.partialorder %v1379_v42, 0.0004427343 }
 0x167   :  { %v1580_v22 = vpop.eup %1579 }
 0x168   :  { %v1582_v56 = vpop.eup %1581  ;;  %v1348_v18 = vmul.f32 0.6931472, %v1580_v22 }
 0x169   :  { %v1584_v27 = vpop.eup %1583  ;;  %v1366_v29 = vmul.f32 0.6931472, %v1582_v56 }
 0x16a   :  { %v1354_v43 = vsel %vm1353_vm2, %v1351_v19, %v1348_v18  ;;  %v1357_v48 = vmul.f32 0.6931472, %v1584_v27  ;;  %v1586_v52 = vpop.eup %1585 }
 0x16b   :  { %v1382_v54 = vadd.f32 %v1354_v43, %v1326_v36  ;;  %v1372_v17 = vsel %vm1371_vm3, %v1369_v41, %v1366_v29  ;;  %v1375_v47 = vmul.f32 0.6931472, %v1586_v52 }
 0x16c   :  { %v1384_v26 = vadd.f32 %v1372_v17, %v1328_v20  ;;  %v1363_v40 = vsel %vm1362_vm4, %v1360_v50, %v1357_v48 }
 0x16d   :  { %1386 = vst [vmem:[#allocation6] sm:$0xff] %v1382_v54  ;;  %v1383_v62 = vadd.f32 %v1363_v40, %v1327_v24  ;;  %v1381_v1 = vsel %vm1380_vm5, %v1378_v49, %v1375_v47 }
 0x16e   :  { %1388 = vst [vmem:[#allocation6 + $0x10] sm:$0xff] %v1384_v26  ;;  %v1385_v2 = vadd.f32 %v1381_v1, %v1329_v63 }
 0x16f   :  { %1387 = vst [vmem:[#allocation6 + $0x8] sm:$0xff] %v1383_v62 }
 0x170   :  { %1389 = vst [vmem:[#allocation6 + $0x18] sm:$0xff] %v1385_v2 }
 0x171   :  { %1642 = shalt.err (!%p1639_p6)
}
 0x172   :  { %s1643_s24 = scalar_lea.hbm %s2081_s4, 512 }
 0x173   :  { %p1644_p7 = scmp.ne.s32.totalorder %s2081_s4, %s1643_s24  ;;  %p1647_p8 = scmp.lt.u32.totalorder %s1643_s24, %s2081_s4 }
 0x175   :  { %p1649_p9 = pnand %p1647_p8, %p1644_p7 }
 0x177   :  { %1652 = shalt.err (!%p1649_p9)
}
 0x178   :  { %1409 = dma.vmem_to_hbm [thread:$0]  %s1407_s20, 512, %s2081_s4, [#allocation7]  }
 0x179   :  { %1655 = dma.done.wait [#allocation4], 512  }
 0x17a   :  { %1656 = vsyncadd [#allocation4], 4294966784 }
 0x17b   :  { %1657 = dma.done.wait [#allocation7], 512  }
 0x17c   :  { %1658 = vsyncadd [#allocation7], 4294966784 }
 0x17d   :  { %1416 = vsyncpa [#allocation3], 1 }
 0x17e   :  { %1417 = vsyncpa [#allocation4], 1 }
 0x17f   :  { %1418 = vsyncpa [#allocation7], 1 }

</bundles_post_ra>
